<compile_context>
chip_gen: v7x
topology: tpu7x:2x2x1
jax: 0.10.0
libtpu: 0.0.40
codegen_flags: <defaults>
</compile_context>

<pallas_src>
import math

import jax
import jax.numpy as jnp
from jax.experimental import pallas as pl
from jax.experimental.pallas import tpu as pltpu  # noqa: F401  (TPU backend)


def _mlp_kernel(x_ref, w1_ref, w23_ref, p_ref, out_ref):
    """Entire MLP forward on one VMEM-resident tile (everything is tiny).

    x_ref   : (8, F)   f32  -- row 0 is the real input row, rest is padding
    w1_ref  : (F, H)   f32
    w23_ref : (2, H, H) f32 -- stacked W2, W3
    p_ref   : (5, H)   f32  -- rows 0..2 = b1,b2,b3; row 3 col 0 = b4;
                               row 4 = w4 as a (1, H) row
    out_ref : (8, 1)   f32
    """
    x = x_ref[...]                                             # (8, F)
    b1 = p_ref[0:1, :]                                         # (1, H)
    b2 = p_ref[1:2, :]
    b3 = p_ref[2:3, :]
    b4 = p_ref[3:4, 0:1]                                       # (1, 1)
    w4 = p_ref[4:5, :]                                         # (1, H)

    h = jnp.dot(x, w1_ref[...], preferred_element_type=jnp.float32)
    h = jnp.maximum(h + b1, 0.0)                               # (8, H)

    h = jnp.dot(h, w23_ref[0], preferred_element_type=jnp.float32)
    h = jnp.maximum(h + b2, 0.0)                               # (8, H)

    h = jnp.dot(h, w23_ref[1], preferred_element_type=jnp.float32)
    h = jnp.maximum(h + b3, 0.0)                               # (8, H)

    # N=1 output column: VPU multiply + XLU lane-reduce instead of an MXU matmul.
    logits = jnp.sum(h * w4, axis=-1, keepdims=True) + b4      # (8, 1)

    # Numerically-stable sigmoid: exp is only ever taken of a non-positive value.
    pos = logits >= 0.0
    z = jnp.exp(jnp.where(pos, -logits, logits))
    out_ref[...] = jnp.where(pos, 1.0, z) / (1.0 + z)


@jax.jit
def binary_network_forward(x, params):
    """Runs the MLP for the (only) row that the module actually returns."""
    w1, b1, w2, b2, w3, b3, w4, b4 = params
    F = x.shape[1]
    H = w1.shape[1]

    # Only op[0] is returned -> compute just row 0, padded to one sublane tile.
    x8 = jnp.pad(x[:1].astype(jnp.float32), ((0, 7), (0, 0)))   # (8, F)

    # Pack operands: 9 arrays -> 4 (fewer DMA descriptors / VMEM buffers).
    w23 = jnp.stack([w2, w3], axis=0)                           # (2, H, H)
    b4_row = jnp.pad(b4, ((0, 0), (0, H - 1)))                  # (1, H)
    small = jnp.concatenate([b1, b2, b3, b4_row, w4.T], axis=0)  # (5, H)

    full = lambda a: pl.BlockSpec(a.shape, lambda: (0,) * a.ndim)

    out = pl.pallas_call(
        _mlp_kernel,
        out_shape=jax.ShapeDtypeStruct((8, 1), jnp.float32),
        grid=(),
        in_specs=[full(x8), full(w1), full(w23), full(small)],
        out_specs=pl.BlockSpec((8, 1), lambda: (0, 0)),
    )(x8, w1, w23, small)

    # PyTorch forward returns op[0]: first row -> shape (1,)
    return out[0]


def init_params(key, features, hidden_size):
    """Xavier-uniform weights (config default) / PyTorch-default uniform biases.

    Weights are stored as (in, out) — transpose of nn.Linear's (out, in).
    """
    # TODO(synk): the PyTorch module reads weight_init from a packaged YAML
    # config; the 'xavier' default branch is implemented here.
    def xavier(key, fan_in, fan_out):
        limit = math.sqrt(6.0 / (fan_in + fan_out))
        return jax.random.uniform(key, (fan_in, fan_out), jnp.float32,
                                  -limit, limit)

    def bias(key, fan_in, fan_out):
        bound = 1.0 / math.sqrt(fan_in)
        return jax.random.uniform(key, (1, fan_out), jnp.float32,
                                  -bound, bound)

    ks = jax.random.split(key, 8)
    w1 = xavier(ks[0], features, hidden_size)
    b1 = bias(ks[1], features, hidden_size)
    w2 = xavier(ks[2], hidden_size, hidden_size)
    b2 = bias(ks[3], hidden_size, hidden_size)
    w3 = xavier(ks[4], hidden_size, hidden_size)
    b3 = bias(ks[5], hidden_size, hidden_size)
    w4 = xavier(ks[6], hidden_size, 1)
    b4 = bias(ks[7], hidden_size, 1)
    return (w1, b1, w2, b2, w3, b3, w4, b4)


if __name__ == "__main__":
    key = jax.random.PRNGKey(0)
    k_x, k_p = jax.random.split(key)

    batch = 8
    features = 8        # e.g. Titanic tabular features
    hidden = 32

    x = jax.random.normal(k_x, (batch, features), jnp.float32)
    params = init_params(k_p, features, hidden)

    y = binary_network_forward(x, params)
    y = jax.block_until_ready(y)

    # Pure-JAX reference check of the same math (full batch, then take row 0).
    w1, b1, w2, b2, w3, b3, w4, b4 = params
    h = jnp.maximum(x @ w1 + b1, 0.0)
    h = jnp.maximum(h @ w2 + b2, 0.0)
    h = jnp.maximum(h @ w3 + b3, 0.0)
    ref = jax.nn.sigmoid(h @ w4 + b4)[0]

    assert y.shape == (1,)
    assert jnp.allclose(y, ref, atol=1e-5, rtol=1e-5)

    print("KERNEL_OK")
</pallas_src>

<mosaic_0001>
module attributes {stable_mosaic.version = 11 : i64} {
  func.func @_mlp_kernel(%arg0: memref<8x8xf32, #tpu.memory_space<vmem>>, %arg1: memref<8x32xf32, #tpu.memory_space<vmem>>, %arg2: memref<2x32x32xf32, #tpu.memory_space<vmem>>, %arg3: memref<5x32xf32, #tpu.memory_space<vmem>>, %arg4: memref<8x1xf32, #tpu.memory_space<vmem>>) attributes {dimension_semantics = [], scalar_prefetch = 0 : i64, scratch_operands = 0 : i64, tpu.core_type = #tpu.core_type<tc>} {
    %c0 = arith.constant 0 : index
    %c0_0 = arith.constant 0 : index
    %0 = vector.load %arg0[%c0, %c0_0] : memref<8x8xf32, #tpu.memory_space<vmem>>, vector<8x8xf32>
    %c0_1 = arith.constant 0 : index
    %c0_2 = arith.constant 0 : index
    %1 = vector.load %arg3[%c0_1, %c0_2] : memref<5x32xf32, #tpu.memory_space<vmem>>, vector<1x32xf32>
    %c1 = arith.constant 1 : index
    %c0_3 = arith.constant 0 : index
    %2 = vector.load %arg3[%c1, %c0_3] : memref<5x32xf32, #tpu.memory_space<vmem>>, vector<1x32xf32>
    %c2 = arith.constant 2 : index
    %c0_4 = arith.constant 0 : index
    %3 = vector.load %arg3[%c2, %c0_4] : memref<5x32xf32, #tpu.memory_space<vmem>>, vector<1x32xf32>
    %c3 = arith.constant 3 : index
    %c0_5 = arith.constant 0 : index
    %4 = vector.load %arg3[%c3, %c0_5] : memref<5x32xf32, #tpu.memory_space<vmem>>, vector<1x1xf32>
    %c4 = arith.constant 4 : index
    %c0_6 = arith.constant 0 : index
    %5 = vector.load %arg3[%c4, %c0_6] : memref<5x32xf32, #tpu.memory_space<vmem>>, vector<1x32xf32>
    %c0_7 = arith.constant 0 : index
    %c0_8 = arith.constant 0 : index
    %6 = vector.load %arg1[%c0_7, %c0_8] : memref<8x32xf32, #tpu.memory_space<vmem>>, vector<8x32xf32>
    %cst = arith.constant dense<0.000000e+00> : vector<8x32xf32>
    %7 = tpu.matmul %0, %6, %cst {dimension_numbers = #tpu.dot_dimension_numbers<[1], [0], [0], [1], [0, 0, 1, 1], [], []>} : vector<8x8xf32>, vector<8x32xf32>, vector<8x32xf32> -> vector<8x32xf32>
    %8 = vector.broadcast %1 : vector<1x32xf32> to vector<8x32xf32>
    %9 = arith.addf %7, %8 : vector<8x32xf32>
    %cst_9 = arith.constant 0.000000e+00 : f32
    %10 = vector.broadcast %cst_9 : f32 to vector<8x32xf32>
    %11 = arith.maximumf %9, %10 : vector<8x32xf32>
    %c0_10 = arith.constant 0 : index
    %c0_11 = arith.constant 0 : index
    %c0_12 = arith.constant 0 : index
    %12 = vector.load %arg2[%c0_10, %c0_11, %c0_12] : memref<2x32x32xf32, #tpu.memory_space<vmem>>, vector<1x32x32xf32>
    %13 = vector.shape_cast %12 : vector<1x32x32xf32> to vector<32x32xf32>
    %cst_13 = arith.constant dense<0.000000e+00> : vector<8x32xf32>
    %14 = tpu.matmul %11, %13, %cst_13 {dimension_numbers = #tpu.dot_dimension_numbers<[1], [0], [0], [1], [0, 0, 1, 1], [], []>} : vector<8x32xf32>, vector<32x32xf32>, vector<8x32xf32> -> vector<8x32xf32>
    %15 = vector.broadcast %2 : vector<1x32xf32> to vector<8x32xf32>
    %16 = arith.addf %14, %15 : vector<8x32xf32>
    %cst_14 = arith.constant 0.000000e+00 : f32
    %17 = vector.broadcast %cst_14 : f32 to vector<8x32xf32>
    %18 = arith.maximumf %16, %17 : vector<8x32xf32>
    %c1_15 = arith.constant 1 : index
    %c0_16 = arith.constant 0 : index
    %c0_17 = arith.constant 0 : index
    %19 = vector.load %arg2[%c1_15, %c0_16, %c0_17] : memref<2x32x32xf32, #tpu.memory_space<vmem>>, vector<1x32x32xf32>
    %20 = vector.shape_cast %19 : vector<1x32x32xf32> to vector<32x32xf32>
    %cst_18 = arith.constant dense<0.000000e+00> : vector<8x32xf32>
    %21 = tpu.matmul %18, %20, %cst_18 {dimension_numbers = #tpu.dot_dimension_numbers<[1], [0], [0], [1], [0, 0, 1, 1], [], []>} : vector<8x32xf32>, vector<32x32xf32>, vector<8x32xf32> -> vector<8x32xf32>
    %22 = vector.broadcast %3 : vector<1x32xf32> to vector<8x32xf32>
    %23 = arith.addf %21, %22 : vector<8x32xf32>
    %cst_19 = arith.constant 0.000000e+00 : f32
    %24 = vector.broadcast %cst_19 : f32 to vector<8x32xf32>
    %25 = arith.maximumf %23, %24 : vector<8x32xf32>
    %26 = vector.broadcast %5 : vector<1x32xf32> to vector<8x32xf32>
    %27 = arith.mulf %25, %26 : vector<8x32xf32>
    %cst_20 = arith.constant dense<0.000000e+00> : vector<8xf32>
    %28 = vector.multi_reduction <add>, %27, %cst_20 [1] : vector<8x32xf32> to vector<8xf32>
    %29 = vector.shape_cast %28 : vector<8xf32> to vector<8x1xf32>
    %30 = vector.broadcast %4 : vector<1x1xf32> to vector<8x1xf32>
    %31 = arith.addf %29, %30 : vector<8x1xf32>
    %cst_21 = arith.constant 0.000000e+00 : f32
    %32 = vector.broadcast %cst_21 : f32 to vector<8x1xf32>
    %33 = arith.cmpf oge, %31, %32 : vector<8x1xf32>
    %cst_22 = arith.constant 0.000000e+00 : f32
    %34 = vector.broadcast %cst_22 : f32 to vector<8x1xf32>
    %35 = arith.subf %34, %31 : vector<8x1xf32>
    %36 = arith.select %33, %35, %31 : vector<8x1xi1>, vector<8x1xf32>
    %37 = math.exp %36 : vector<8x1xf32>
    %cst_23 = arith.constant 1.000000e+00 : f32
    %38 = vector.broadcast %cst_23 : f32 to vector<8x1xf32>
    %39 = arith.select %33, %38, %37 : vector<8x1xi1>, vector<8x1xf32>
    %cst_24 = arith.constant 1.000000e+00 : f32
    %40 = vector.broadcast %cst_24 : f32 to vector<8x1xf32>
    %41 = arith.addf %40, %37 : vector<8x1xf32>
    %42 = arith.divf %39, %41 : vector<8x1xf32>
    %c0_25 = arith.constant 0 : index
    %c0_26 = arith.constant 0 : index
    %43 = vector.load %arg4[%c0_25, %c0_26] : memref<8x1xf32, #tpu.memory_space<vmem>>, vector<8x1xf32>
    tpu.vector_store %arg4[%c0_25, %c0_26], %42 {strides = array<i32>} : memref<8x1xf32, #tpu.memory_space<vmem>>, vector<8x1xf32>,
    return
  }
}

</mosaic_0001>

<bundles_post_ra>
// kernel: binary_network_forward.1
= control target key start
LH: loop header
LB: loop body
LE: loop exit
PB: predicated region body
PF: predicated region fallthrough
CT: control target
= control target key end

     0   :  { %vm28_vm0 = vcmask 64512   ;;  %v367_v0 = vmov 0.0   ;;  %vm368_vm1 = vmmov 0   ;;  %v369_v4 = vmov 0.0|0.0   ;;  %s446_s1 = inlined_call_operand.vmem [shape: f32[8,32], index: 1, kind: input, shape index: {}]   ;;  %s447_s0 = inlined_call_operand.vmem [shape: f32[8,8], index: 0, kind: input, shape index: {}]   ;;  %s448_s2 = inlined_call_operand.vmem [shape: f32[2,32,32], index: 2, kind: input, shape index: {}]   ;;  %s449_s3 = inlined_call_operand.vmem [shape: f32[5,32], index: 3, kind: input, shape index: {}]   ;;  %s450_s4 = inlined_call_operand.vmem [shape: f32[8,1], index: 4, kind: output, shape index: {}]  }
   0x1   :  { %321 = vmatprep.subr.mxu0 %v367_v0  ;;  %v23_v1 = vld [vmem:[%s446_s1] sm:$0xff]  ;;  %323 = vmatprep.mubr.msk.f32.mxu0 %vm368_vm1, %v367_v0  ;;  %v104_v5 = vld [vmem:[%s448_s2 + $0x8] sm:$0xff]  ;;  %v105_v7 = vld [vmem:[%s448_s2 + $0x10] sm:$0xff]  ;;  %vm111_vm2 = vcmask 261120   ;;  %vm291_vm4 = vcmask 7168  }
   0x2   :  { %v17_v2 = vld [vmem:[%s447_s0] sm:$0xff]  ;;  %322 = vmatpush3.msra.mxu0 %v23_v1  ;;  %348 = vmatprep.subr.bf16.mxu1 %v369_v4  ;;  %v106_v8 = vld [vmem:[%s448_s2 + $0x18] sm:$0xff]  ;;  %v302_v11 = vld [vmem:[%s448_s2 + $0x28] sm:$0xff] }
   0x3   :  { %v103_v3 = vld [vmem:[%s448_s2] sm:$0xff]  ;;  %324 = vmatmul.mubr.msk.f32.vlgmr.msra.gmra.mrb[0].mxu0 %vm28_vm0, %v17_v2  ;;  %334 = vmatprep.mubr.msk.f32.mxu1 %vm368_vm1, %v367_v0  ;;  %v352_v9 = vpack.c.bf16 %v106_v8, %v105_v7  ;;  %v303_v18 = vld [vmem:[%s448_s2 + $0x30] sm:$0xff]  ;;  %v304_v19 = vld [vmem:[%s448_s2 + $0x38] sm:$0xff] }
   0x4   :  { %v349_v6 = vpack.c.bf16 %v104_v5, %v103_v3  ;;  %354 = vmatprep.subr.bf16.mxu0 %v369_v4  ;;  %345 = vmatprep.mubr.msk.f32.mxu0 %vm368_vm1, %v367_v0  ;;  %v301_v10 = vld [vmem:[%s448_s2 + $0x20] sm:$0xff]  ;;  %v358_v20 = vpack.c.bf16 %v304_v19, %v303_v18 }
   0x5   :  { %v355_v12 = vpack.c.bf16 %v302_v11, %v301_v10  ;;  %v297_v13 = vld [vmem:[%s449_s3] ss:$0 sm:$0xff]  ;;  %v299_v21 = vld [vmem:[%s449_s3 + $0x1] ss:$0 sm:$0xff]  ;;  %v305_v26 = vld [vmem:[%s449_s3 + $0x2] ss:$0 sm:$0xff] }
   0x6   :  { %350 = vmatpush3.bf16.msra.mxu1 %v349_v6  ;;  %v307_v30 = vld [vmem:[%s449_s3 + $0x4] ss:$0 sm:$0xff]  ;;  %v308_v34 = vld [vmem:[%s449_s3 + $0x3] ss:$0 sm:$0xff] }
   0x7   :  { %351 = vmatprep.subr.bf16.mxu1 %v369_v4  ;;  %356 = vmatpush3.bf16.msra.mxu0 %v355_v12 }
   0x8   :  { %357 = vmatprep.subr.bf16.mxu0 %v369_v4 }
   0xa   :  { %353 = vmatpush3.bf16.msra.mxu1 %v352_v9 }
   0xb   :  { %359 = vmatpush3.bf16.msra.mxu0 %v358_v20 }
  0xd6   :  { %v98_v14 = vpop.f32.mrb[0].mxu0 }
  0xd7   :  { %v99_v15 = vadd.f32 %v297_v13, %v98_v14  ;;  %v325_v16 = vpop.f32.mrb[1].mxu0 }
  0xd9   :  { %v102_v17 = vmax.f32 %v99_v15, 0.0 }
  0xdb   :  { %335 = vmatmul.mubr.msk.f32.vlgmr.msra.gmra.mrb[0].mxu1 %vm111_vm2, %v102_v17 }
 0x1ae   :  { %v181_v22 = vpop.f32.mrb[0].mxu1 }
 0x1af   :  { %v182_v23 = vadd.f32 %v299_v21, %v181_v22  ;;  %v336_v24 = vpop.f32.mrb[1].mxu1 }
 0x1b1   :  { %v185_v25 = vmax.f32 %v182_v23, 0.0 }
 0x1b3   :  { %346 = vmatmul.mubr.msk.f32.vlgmr.msra.gmra.mrb[2].mxu0 %vm111_vm2, %v185_v25 }
 0x286   :  { %v264_v27 = vpop.f32.mrb[2].mxu0 }
 0x287   :  { %v265_v28 = vadd.f32 %v305_v26, %v264_v27  ;;  %v347_v29 = vpop.f32.mrb[3].mxu0 }
 0x289   :  { %v268_v31 = vmax.f32 %v265_v28, 0.0 }
 0x28b   :  { %v273_v32 = vmul.f32 %v307_v30, %v268_v31 }
 0x28d   :  { %v274_v33 = vsel %vm111_vm2, %v273_v32, 0.0 }
 0x28e   :  { %275 = vadd.xlane.f32.xlu0 %v274_v33 }
 0x31b   :  { %v276_v35 = vpop.xlane.xlu0 %275 }
 0x31c   :  { %v281_v36 = vadd.f32 %v308_v34, %v276_v35 }
 0x31e   :  { %vm282_vm3 = vcmp.ge.f32.partialorder %v281_v36, 0.0  ;;  %v283_v37 = vsub.f32 0.0, %v281_v36 }
 0x320   :  { %v284_v38 = vsel %vm282_vm3, %v283_v37, %v281_v36 }
 0x321   :  { %v285_v39 = vmul.f32 1.442695, %v284_v38 }
 0x323   :  { %363 = vpow2.f32 %v285_v39 }
 0x32d   :  { %v364_v40 = vpop.eup %363 }
 0x32e   :  { %v288_v41 = vadd.f32 1.0, %v364_v40  ;;  %v287_v43 = vsel %vm282_vm3, 1.0, %v364_v40 }
 0x330   :  { %365 = vrcp.f32 %v288_v41 }
 0x33a   :  { %v366_v42 = vpop.eup %365 }
 0x33b   :  { %v290_v44 = vmul.f32 %v366_v42, %v287_v43 }
 0x33d   :  { %292 = vst.msk [vmem:[%s450_s4] sm:$0xff] %vm291_vm4, %v290_v44 }

</bundles_post_ra>
